<compile_context>
chip_gen: v6e
topology: v6e:2x2x1
jax: 0.10.0
libtpu: 0.0.40
codegen_flags: <defaults>
</compile_context>

<pallas_src>
import jax
import jax.numpy as jnp
from jax.experimental import pallas as pl
from jax.experimental.pallas import tpu as pltpu


def _round_up(x, m):
    return ((x + m - 1) // m) * m


def _vmem_capacity_bytes():
    """Best-effort physical VMEM capacity (fallback: 64 MiB, the v7x per-TC size)."""
    try:
        cap = int(pltpu.get_tpu_info().vmem_capacity_bytes)
        if cap >= (16 << 20):
            return cap
    except Exception:
        pass
    return 64 << 20


def _ffn_plan(M, E_pad, F_pad, w_item, o_item):
    """Pick (tm, tf, M_pad, resident, vmem_limit) from static shapes/dtypes."""
    # Sublane packing: f32 -> 8 rows/vreg, bf16 -> 16, 8-bit -> 32.
    sub = 8 if w_item >= 4 else (16 if w_item == 2 else 32)

    cap = _vmem_capacity_bytes()
    vmem_limit = min(int(cap * 0.78), 100 << 20)   # ~100 MiB on v5e/v6e, ~50 MiB on v7x
    budget = int(vmem_limit * 0.85)                # headroom for compiler scratch/sems

    def usage(tm, tf, resident):
        acc = 0 if (resident or o_item == 4) else tm * E_pad * 4   # f32 scratch acc
        h = tm * tf * 4                                            # f32 intermediate
        xb = 2 * tm * E_pad * w_item                               # double-buffered x
        ob = 2 * tm * E_pad * o_item                               # double-buffered out
        wmul = 1 if resident else 2                                # resident: single copy
        wb = wmul * 2 * E_pad * tf * w_item + (tf + E_pad) * 4     # W_in + W_out + biases
        return acc + h + xb + ob + wb

    M_pad0 = _round_up(max(M, 1), sub)

    tm_cands = []
    for t in (1024, 512, 256, 128, 64, 32, 16, 8):
        if t % sub:
            continue
        t = min(t, M_pad0)
        if t not in tm_cands:
            tm_cands.append(t)

    tm = tf = None
    resident = False

    # 1) Prefer fully VMEM-resident weights (tf = F_pad, weights fetched once).
    for t in tm_cands:
        if usage(t, F_pad, True) <= budget:
            tm, tf, resident = t, F_pad, True
            break

    # 2) Otherwise stream F in the largest block that fits, with the largest tm
    #    (tm dominates weight HBM traffic: weights are re-read M_pad/tm times).
    if tm is None:
        tf_cands = [d for d in range(F_pad, 127, -128) if F_pad % d == 0]
        for t in tm_cands:
            for f in tf_cands:
                if usage(t, f, False) <= budget:
                    tm, tf = t, f
                    break
            if tm is not None:
                break

    # 3) Last resort: smallest tiles (let the compiler decide if truly infeasible).
    if tm is None:
        tm, tf = tm_cands[-1], 128

    # Guarantee >=2 M tiles when M allows, so "parallel" can shard the row-tiles
    # across v7x's two TensorCores (no-op on v5e/v6e single-TC parts).
    if -(-M_pad0 // tm) == 1 and M_pad0 >= 2 * sub:
        tm = _round_up(-(-M_pad0 // 2), sub)

    M_pad = _round_up(M_pad0, tm)
    return tm, tf, M_pad, resident, vmem_limit


def ffn_resident_kernel(x_ref, w_in_ref, b_in_ref, w_out_ref, b_out_ref, o_ref):
    # Weights fully resident in VMEM; one grid axis over M tiles.
    h = jnp.dot(x_ref[...], w_in_ref[...], preferred_element_type=jnp.float32)
    h = jnp.maximum(h + b_in_ref[...], 0.0)          # bias + ReLU in f32 (VPU)
    # TODO(synk): dropout is identity in eval mode; training would need
    # pltpu.prng_seed/prng_random_bits masking here.
    out = jnp.dot(h.astype(w_out_ref.dtype), w_out_ref[...],
                  preferred_element_type=jnp.float32)
    o_ref[...] = (out + b_out_ref[...]).astype(o_ref.dtype)


def ffn_stream_kernel(x_ref, w_in_ref, b_in_ref, w_out_ref, b_out_ref, o_ref, *scratch):
    # F streamed in blocks; accumulate in f32.  For f32 outputs we accumulate
    # directly into o_ref (output block is resident across the F axis); for
    # other output dtypes an f32 VMEM scratch is provided.
    acc_ref = scratch[0] if scratch else o_ref
    fi = pl.program_id(1)

    @pl.when(fi == 0)
    def _init():
        acc_ref[...] = jnp.zeros_like(acc_ref)

    h = jnp.dot(x_ref[...], w_in_ref[...], preferred_element_type=jnp.float32)
    h = jnp.maximum(h + b_in_ref[...], 0.0)          # bias + ReLU in f32
    acc_ref[...] += jnp.dot(h.astype(w_out_ref.dtype), w_out_ref[...],
                            preferred_element_type=jnp.float32).astype(acc_ref.dtype)

    @pl.when(fi == pl.num_programs(1) - 1)
    def _fin():
        o_ref[...] = (acc_ref[...].astype(jnp.float32)
                      + b_out_ref[...]).astype(o_ref.dtype)


def prepare_ffn_params(w_in, b_in, w_out, b_out, compute_dtype=None):
    """One-time param prep (outside the hot path): transpose to [in, out]
    layouts, optionally cast weights to a compute dtype (e.g. bf16), and
    zero-pad lane dims to multiples of 128.  Biases stay f32 (epilogue in f32)."""
    ff_dim, embed_dim = w_in.shape
    E_pad = _round_up(embed_dim, 128)
    F_pad = _round_up(ff_dim, 128)
    wdt = jnp.dtype(compute_dtype) if compute_dtype is not None else w_in.dtype

    w_in_t = jnp.zeros((E_pad, F_pad), wdt).at[:embed_dim, :ff_dim].set(
        w_in.T.astype(wdt))
    w_out_t = jnp.zeros((F_pad, E_pad), wdt).at[:ff_dim, :embed_dim].set(
        w_out.T.astype(wdt))
    b_in_p = jnp.zeros((1, F_pad), jnp.float32).at[0, :ff_dim].set(
        b_in.astype(jnp.float32))
    b_out_p = jnp.zeros((1, E_pad), jnp.float32).at[0, :embed_dim].set(
        b_out.astype(jnp.float32))
    return w_in_t, b_in_p, w_out_t, b_out_p


@jax.jit
def feed_forward_prepared(x, w_in_t, b_in_p, w_out_t, b_out_p):
    """x: [..., embed_dim]; params already transposed/padded (prepare_ffn_params)."""
    orig_shape = x.shape
    E = orig_shape[-1]
    M = 1
    for d in orig_shape[:-1]:
        M *= int(d)

    E_pad, F_pad = w_in_t.shape
    w_dtype = w_in_t.dtype
    out_dtype = x.dtype
    w_item = jnp.dtype(w_dtype).itemsize
    o_item = jnp.dtype(out_dtype).itemsize

    tm, tf, M_pad, resident, vmem_limit = _ffn_plan(M, E_pad, F_pad, w_item, o_item)
    n_m = M_pad // tm

    x2d = x.reshape(M, E)
    if x2d.dtype != w_dtype:
        x2d = x2d.astype(w_dtype)
    if M_pad != M or E_pad != E:
        x2d = jnp.pad(x2d, ((0, M_pad - M), (0, E_pad - E)))

    # Cost hint reflecting real DMA traffic (weights re-read per M-tile if streamed).
    flops = 4 * M_pad * E_pad * F_pad
    weight_bytes = 2 * E_pad * F_pad * w_item
    weight_passes = 1 if resident else n_m
    bytes_accessed = (M_pad * E_pad * w_item            # x
                      + M_pad * E_pad * o_item          # out
                      + weight_passes * weight_bytes    # W_in + W_out
                      + (F_pad + E_pad) * 4)            # biases
    cost = pl.CostEstimate(flops=flops, transcendentals=0,
                           bytes_accessed=bytes_accessed)

    if resident:
        grid = (n_m,)
        in_specs = [
            pl.BlockSpec((tm, E_pad), lambda i: (i, 0)),      # x tile
            pl.BlockSpec((E_pad, F_pad), lambda i: (0, 0)),   # W_in (resident)
            pl.BlockSpec((1, F_pad), lambda i: (0, 0)),       # b_in (resident)
            pl.BlockSpec((F_pad, E_pad), lambda i: (0, 0)),   # W_out (resident)
            pl.BlockSpec((1, E_pad), lambda i: (0, 0)),       # b_out (resident)
        ]
        out_specs = pl.BlockSpec((tm, E_pad), lambda i: (i, 0))
        scratch_shapes = []
        kernel = ffn_resident_kernel
        dims = ("parallel",)
    else:
        grid = (n_m, F_pad // tf)
        in_specs = [
            pl.BlockSpec((tm, E_pad), lambda i, f: (i, 0)),   # x tile
            pl.BlockSpec((E_pad, tf), lambda i, f: (0, f)),   # W_in block
            pl.BlockSpec((1, tf), lambda i, f: (0, f)),       # b_in block
            pl.BlockSpec((tf, E_pad), lambda i, f: (f, 0)),   # W_out block
            pl.BlockSpec((1, E_pad), lambda i, f: (0, 0)),    # b_out (resident)
        ]
        out_specs = pl.BlockSpec((tm, E_pad), lambda i, f: (i, 0))
        use_scratch = jnp.dtype(out_dtype) != jnp.dtype(jnp.float32)
        scratch_shapes = ([pltpu.VMEM((tm, E_pad), jnp.float32)]
                          if use_scratch else [])
        kernel = ffn_stream_kernel
        dims = ("parallel", "arbitrary")

    out2d = pl.pallas_call(
        kernel,
        out_shape=jax.ShapeDtypeStruct((M_pad, E_pad), out_dtype),
        grid_spec=pltpu.PrefetchScalarGridSpec(
            num_scalar_prefetch=0,
            grid=grid,
            in_specs=in_specs,
            out_specs=out_specs,
            scratch_shapes=scratch_shapes,
        ),
        compiler_params=pltpu.CompilerParams(
            dimension_semantics=dims,
            vmem_limit_bytes=vmem_limit,
        ),
        cost_estimate=cost,
    )(x2d, w_in_t, b_in_p, w_out_t, b_out_p)

    if M_pad != M or E_pad != E:
        out2d = out2d[:M, :E]
    return out2d.reshape(orig_shape)


def feed_forward(x, w_in, b_in, w_out, b_out, compute_dtype=None):
    """Convenience wrapper taking PyTorch-layout params:
       w_in: [ff_dim, embed_dim], b_in: [ff_dim],
       w_out: [embed_dim, ff_dim], b_out: [embed_dim]."""
    params = prepare_ffn_params(w_in, b_in, w_out, b_out, compute_dtype)
    return feed_forward_prepared(x, *params)


if __name__ == "__main__":
    # Small demo shapes consistent with the module's forward pass.
    batch, seq = 2, 8
    embed_dim, ff_dim = 32, 64

    key = jax.random.PRNGKey(0)
    k_x, k_win, k_wout = jax.random.split(key, 3)

    std = (2.0 / (ff_dim + embed_dim)) ** 0.5
    # PyTorch Linear layouts: in_proj [ff_dim, embed_dim], out_proj [embed_dim, ff_dim]
    w_in = std * jax.random.normal(k_win, (ff_dim, embed_dim), dtype=jnp.float32)
    w_out = std * jax.random.normal(k_wout, (embed_dim, ff_dim), dtype=jnp.float32)
    b_in = jnp.zeros((ff_dim,), dtype=jnp.float32)
    b_out = jnp.zeros((embed_dim,), dtype=jnp.float32)

    x = jax.random.normal(k_x, (batch, seq, embed_dim), dtype=jnp.float32)

    # Pure-JAX reference (eval-mode dropout == identity).
    ref = jnp.maximum(x @ w_in.T + b_in, 0.0) @ w_out.T + b_out

    # f32 compute path: params prepared once, then the jitted kernel call.
    p32 = prepare_ffn_params(w_in, b_in, w_out, b_out)
    out32 = jax.block_until_ready(feed_forward_prepared(x, *p32))
    assert out32.shape == (batch, seq, embed_dim)
    assert jnp.allclose(out32, ref, atol=1e-5, rtol=1e-5)

    # bf16 compute path (halved HBM/VMEM traffic, native MXU bf16 rate);
    # f32 accumulation + f32 epilogue, looser tolerance vs f32 reference.
    pbf = prepare_ffn_params(w_in, b_in, w_out, b_out, compute_dtype=jnp.bfloat16)
    outbf = jax.block_until_ready(feed_forward_prepared(x, *pbf))
    assert outbf.shape == (batch, seq, embed_dim)
    assert jnp.allclose(outbf, ref, atol=5e-2, rtol=5e-2)

    print("KERNEL_OK")
</pallas_src>

<mosaic_0001>
module attributes {stable_mosaic.version = 11 : i64} {
  func.func @ffn_resident_kernel(%arg0: i32, %arg1: memref<8x128xf32, #tpu.memory_space<vmem>>, %arg2: memref<128x128xf32, #tpu.memory_space<vmem>>, %arg3: memref<1x128xf32, #tpu.memory_space<vmem>>, %arg4: memref<128x128xf32, #tpu.memory_space<vmem>>, %arg5: memref<1x128xf32, #tpu.memory_space<vmem>>, %arg6: memref<8x128xf32, #tpu.memory_space<vmem>>) attributes {dimension_semantics = [#tpu.dimension_semantics<parallel>], iteration_bounds = array<i64: 2>, scalar_prefetch = 0 : i64, scratch_operands = 0 : i64, tpu.core_type = #tpu.core_type<tc>, window_params = [{transform_indices = @transform_0, window_bounds = array<i64: 8, 128>}, {pipeline_mode = #tpu.pipeline_mode<synchronous>, transform_indices = @transform_1, window_bounds = array<i64: 128, 128>}, {pipeline_mode = #tpu.pipeline_mode<synchronous>, transform_indices = @transform_2, window_bounds = array<i64: 1, 128>}, {pipeline_mode = #tpu.pipeline_mode<synchronous>, transform_indices = @transform_3, window_bounds = array<i64: 128, 128>}, {pipeline_mode = #tpu.pipeline_mode<synchronous>, transform_indices = @transform_4, window_bounds = array<i64: 1, 128>}, {transform_indices = @transform_5, window_bounds = array<i64: 8, 128>}]} {
    %c0 = arith.constant 0 : index
    %c0_0 = arith.constant 0 : index
    %0 = vector.load %arg1[%c0, %c0_0] : memref<8x128xf32, #tpu.memory_space<vmem>>, vector<8x128xf32>
    %c0_1 = arith.constant 0 : index
    %c0_2 = arith.constant 0 : index
    %1 = vector.load %arg2[%c0_1, %c0_2] : memref<128x128xf32, #tpu.memory_space<vmem>>, vector<128x128xf32>
    %cst = arith.constant dense<0.000000e+00> : vector<8x128xf32>
    %2 = tpu.matmul %0, %1, %cst {dimension_numbers = #tpu.dot_dimension_numbers<[1], [0], [0], [1], [0, 0, 1, 1], [], []>} : vector<8x128xf32>, vector<128x128xf32>, vector<8x128xf32> -> vector<8x128xf32>
    %c0_3 = arith.constant 0 : index
    %c0_4 = arith.constant 0 : index
    %3 = vector.load %arg3[%c0_3, %c0_4] : memref<1x128xf32, #tpu.memory_space<vmem>>, vector<1x128xf32>
    %4 = vector.broadcast %3 : vector<1x128xf32> to vector<8x128xf32>
    %5 = arith.addf %2, %4 : vector<8x128xf32>
    %cst_5 = arith.constant 0.000000e+00 : f32
    %6 = vector.broadcast %cst_5 : f32 to vector<8x128xf32>
    %7 = arith.maximumf %5, %6 : vector<8x128xf32>
    %c0_6 = arith.constant 0 : index
    %c0_7 = arith.constant 0 : index
    %8 = vector.load %arg4[%c0_6, %c0_7] : memref<128x128xf32, #tpu.memory_space<vmem>>, vector<128x128xf32>
    %cst_8 = arith.constant dense<0.000000e+00> : vector<8x128xf32>
    %9 = tpu.matmul %7, %8, %cst_8 {dimension_numbers = #tpu.dot_dimension_numbers<[1], [0], [0], [1], [0, 0, 1, 1], [], []>} : vector<8x128xf32>, vector<128x128xf32>, vector<8x128xf32> -> vector<8x128xf32>
    %c0_9 = arith.constant 0 : index
    %c0_10 = arith.constant 0 : index
    %10 = vector.load %arg5[%c0_9, %c0_10] : memref<1x128xf32, #tpu.memory_space<vmem>>, vector<1x128xf32>
    %11 = vector.broadcast %10 : vector<1x128xf32> to vector<8x128xf32>
    %12 = arith.addf %9, %11 : vector<8x128xf32>
    %c0_11 = arith.constant 0 : index
    %c0_12 = arith.constant 0 : index
    %13 = vector.load %arg6[%c0_11, %c0_12] : memref<8x128xf32, #tpu.memory_space<vmem>>, vector<8x128xf32>
    tpu.vector_store %arg6[%c0_11, %c0_12], %12 {strides = array<i32>} : memref<8x128xf32, #tpu.memory_space<vmem>>, vector<8x128xf32>,
    return
  }
  func.func @transform_0(%arg0: i32) -> (i32, i32) {
    %c0_i32 = arith.constant 0 : i32
    %c0_i32_0 = arith.constant 0 : i32
    return %arg0, %c0_i32 : i32, i32
  }
  func.func @transform_1(%arg0: i32) -> (i32, i32) {
    %c0_i32 = arith.constant 0 : i32
    %c0_i32_0 = arith.constant 0 : i32
    %c0_i32_1 = arith.constant 0 : i32
    return %c0_i32, %c0_i32_0 : i32, i32
  }
  func.func @transform_2(%arg0: i32) -> (i32, i32) {
    %c0_i32 = arith.constant 0 : i32
    %c0_i32_0 = arith.constant 0 : i32
    %c0_i32_1 = arith.constant 0 : i32
    return %c0_i32, %c0_i32_0 : i32, i32
  }
  func.func @transform_3(%arg0: i32) -> (i32, i32) {
    %c0_i32 = arith.constant 0 : i32
    %c0_i32_0 = arith.constant 0 : i32
    %c0_i32_1 = arith.constant 0 : i32
    return %c0_i32, %c0_i32_0 : i32, i32
  }
  func.func @transform_4(%arg0: i32) -> (i32, i32) {
    %c0_i32 = arith.constant 0 : i32
    %c0_i32_0 = arith.constant 0 : i32
    %c0_i32_1 = arith.constant 0 : i32
    return %c0_i32, %c0_i32_0 : i32, i32
  }
  func.func @transform_5(%arg0: i32) -> (i32, i32) {
    %c0_i32 = arith.constant 0 : i32
    %c0_i32_0 = arith.constant 0 : i32
    return %arg0, %c0_i32 : i32, i32
  }
}

</mosaic_0001>

<bundles_post_ra>
// kernel: feed_forward_prepared.1
= control target key start
LH: loop header
LB: loop body
LE: loop exit
PB: predicated region body
PF: predicated region fallthrough
CT: control target
= control target key end

     0   :  { %10 = vsyncpa [#allocation3], 0  ;;  %s879_s0 = inlined_call_operand.vmem [shape: f32[16,128], index: 0, kind: input, shape index: {}]   ;;  %s880_s1 = inlined_call_operand.hbm [shape: f32[128,128], index: 1, kind: input, shape index: {}]   ;;  %s881_s2 = inlined_call_operand.vmem [shape: f32[1,128], index: 2, kind: input, shape index: {}]   ;;  %s882_s3 = inlined_call_operand.hbm [shape: f32[128,128], index: 3, kind: input, shape index: {}]   ;;  %s883_s4 = inlined_call_operand.vmem [shape: f32[1,128], index: 4, kind: input, shape index: {}]   ;;  %s884_s5 = inlined_call_operand.vmem [shape: f32[16,128], index: 5, kind: output, shape index: {}]  }
   0x1   :  { %11 = vsyncpa [#allocation5], 0  ;;  %s770_s18 = smov 0  }
   0x2 LB: > { %s776_s19 = sadd.s32 4294967295, %s732_s18   ;;  %p516_p0 = scmp.ge.s32.totalorder %s732_s18, 1  ;;  %s732_s18 = sphi %s770_s18, %s17_s18  }
   0x3   : > { %p158_p1 = scmp.lt.s32.totalorder %s732_s18, 3  ;;  %s734_s20 = smov [#allocation2]  }
   0x4   : > { %s170_s21 = sshll.u32 %s734_s20, 4  ;;  %p648_p3 = scmp.eq.s32.totalorder %s776_s19, 0  ;;  %s171_s21 = int_to_ptr.vmem [resolvable:$true] %s170_s21 }
   0x5   : > { %p780_p2 = pnand %p516_p0, %p158_p1  ;;  %s735_s23 = smov [#allocation4]  }
   0x6   : > { %s186_s24 = sshll.u32 %s735_s23, 4  ;;  %s677_s26 = scalar_lea.vmem %s171_s21, 2048  ;;  %s187_s24 = int_to_ptr.vmem [resolvable:$true] %s186_s24 }
   0x7   : > { %p641_p4 = pneg %p780_p2  ;;  %p678_p7 = scmp.ne.s32.totalorder %s171_s21, %s677_s26 }
   0x8   : > { %p685_p10 = scmp.lt.s32.totalorder %s171_s21, %s171_s21  ;;  %p686_p11 = scmp.lt.s32.totalorder %s677_s26, %s677_s26 }
   0x9   : > { %p789_p5 = pnand %p648_p3, %p641_p4 }
   0xa   : > { %p687_p12 = por %p686_p11, %p685_p10 }
   0xb   : > { %p668_p6 = pneg %p789_p5 }
   0xd   : > { %p680_p8 = pnand %p678_p7, %p668_p6 }
   0xf   : > { %p681_p9 = pneg %p680_p8 }
  0x11   : > { %p688_p13 = pnand %p687_p12, %p681_p9 }
  0x13   : > { %691 = shalt.err (!%p688_p13)
}
  0x14   : > { %s736_s27 = smov 128   ;;  %s737_s28 = smov 8  }
  0x15   : > { %644 = dma.hbm_to_vmem [thread:$0]  (!%p789_p5), %s880_s1, 2048, %s171_s21, [#allocation3], %s736_s27, %s736_s27, %s737_s28  }
  0x16   : > { %s703_s6 = scalar_lea.vmem %s187_s24, 2048  ;;  %p711_p7 = scmp.lt.s32.totalorder %s187_s24, %s187_s24 }
  0x17   : > { %p704_p0 = scmp.ne.s32.totalorder %s187_s24, %s703_s6  ;;  %p712_p8 = scmp.lt.s32.totalorder %s703_s6, %s703_s6 }
  0x19   : > { %p706_p1 = pnand %p704_p0, %p668_p6  ;;  %p713_p10 = por %p712_p8, %p711_p7 }
  0x1b   : > { %p707_p4 = pneg %p706_p1 }
  0x1d   : > { %p714_p9 = pnand %p713_p10, %p707_p4 }
  0x1f   : > { %717 = shalt.err (!%p714_p9)
}
  0x20   : > { %647 = dma.hbm_to_vmem [thread:$0]  (!%p789_p5), %s882_s3, 2048, %s187_s24, [#allocation5], %s736_s27, %s736_s27, %s737_s28  }
  0x21   : > { %212 = sbr.rel (%p780_p2) target bundleno = 468 (0x1d4), region = 40 }
  0x26   : > { %723 = dma.done.wait (%p648_p3), [#allocation3], 2048  }
  0x27   : > { %725 = vsyncadd (%p648_p3), [#allocation3], 4294965248 }
  0x28   : > { %727 = dma.done.wait (%p648_p3), [#allocation5], 2048  }
  0x29   : > { %729 = vsyncadd (%p648_p3), [#allocation5], 4294965248  ;;  %v738_v0 = vmov 0.0   ;;  %vm739_vm0 = vmmov 0   ;;  %v266_v1 = vld [vmem:[#allocation2 + $0x78] sm:$0xff]  ;;  %v265_v2 = vld [vmem:[#allocation2 + $0x70] sm:$0xff] }
  0x2a   : > { %563 = vmatprep.subr.mxu0 %v738_v0  ;;  %595 = vmatprep.mubr.msk.f32.mxu0 %vm739_vm0, %v738_v0  ;;  %v264_v3 = vld [vmem:[#allocation2 + $0x68] sm:$0xff]  ;;  %v263_v4 = vld [vmem:[#allocation2 + $0x60] sm:$0xff]  ;;  %v360_v5 = vld [vmem:[#allocation4 + $0x78] sm:$0xff]  ;;  %p242_p2 = scmp.lt.s32.totalorder %s776_s19, 1 }
  0x2b   : > { %598 = vmatprep.subr.mxu1 %v738_v0  ;;  %630 = vmatprep.mubr.msk.f32.mxu1 %vm739_vm0, %v738_v0  ;;  %v262_v6 = vld [vmem:[#allocation2 + $0x58] sm:$0xff]  ;;  %v359_v7 = vld [vmem:[#allocation4 + $0x70] sm:$0xff]  ;;  %v358_v8 = vld [vmem:[#allocation4 + $0x68] sm:$0xff] }
  0x2c   : > { %564 = vmatpush3.msra.mxu0 %v266_v1  ;;  %599 = vmatpush3.msra.mxu1 %v360_v5  ;;  %v261_v9 = vld [vmem:[#allocation2 + $0x50] sm:$0xff]  ;;  %v357_v10 = vld [vmem:[#allocation4 + $0x60] sm:$0xff]  ;;  %v260_v11 = vld [vmem:[#allocation2 + $0x48] sm:$0xff]  ;;  %s888_s19 = smov (!%p242_p2, %s776_s19), 1 }
  0x2d   : > { %565 = vmatprep.subr.mxu0 %v738_v0  ;;  %600 = vmatprep.subr.mxu1 %v738_v0  ;;  %v356_v12 = vld [vmem:[#allocation4 + $0x58] sm:$0xff]  ;;  %v259_v13 = vld [vmem:[#allocation2 + $0x40] sm:$0xff]  ;;  %v355_v14 = vld [vmem:[#allocation4 + $0x50] sm:$0xff]  ;;  %s523_s9 = sshll.u32 %s888_s19, 3 }
  0x2e   : > { %566 = vmatpush3.msra.mxu0 %v265_v2  ;;  %601 = vmatpush3.msra.mxu1 %v359_v7  ;;  %v258_v15 = vld [vmem:[#allocation2 + $0x38] sm:$0xff]  ;;  %v354_v16 = vld [vmem:[#allocation4 + $0x48] sm:$0xff]  ;;  %v257_v17 = vld [vmem:[#allocation2 + $0x30] sm:$0xff]  ;;  %s245_s12 = scalar_lea.vmem %s879_s0, %s523_s9  ;;  %s249_s21 = scalar_lea.vmem %s884_s5, %s523_s9 }
  0x2f   : > { %567 = vmatprep.subr.mxu0 %v738_v0  ;;  %602 = vmatprep.subr.mxu1 %v738_v0  ;;  %v353_v18 = vld [vmem:[#allocation4 + $0x40] sm:$0xff]  ;;  %v256_v19 = vld [vmem:[#allocation2 + $0x28] sm:$0xff]  ;;  %v352_v20 = vld [vmem:[#allocation4 + $0x38] sm:$0xff] }
  0x30   : > { %568 = vmatpush3.msra.mxu0 %v264_v3  ;;  %603 = vmatpush3.msra.mxu1 %v358_v8  ;;  %v255_v21 = vld [vmem:[#allocation2 + $0x20] sm:$0xff]  ;;  %v351_v22 = vld [vmem:[#allocation4 + $0x30] sm:$0xff]  ;;  %v254_v23 = vld [vmem:[#allocation2 + $0x18] sm:$0xff] }
  0x31   : > { %569 = vmatprep.subr.mxu0 %v738_v0  ;;  %604 = vmatprep.subr.mxu1 %v738_v0  ;;  %v350_v24 = vld [vmem:[#allocation4 + $0x28] sm:$0xff]  ;;  %v253_v25 = vld [vmem:[#allocation2 + $0x10] sm:$0xff]  ;;  %v349_v26 = vld [vmem:[#allocation4 + $0x20] sm:$0xff] }
  0x32   : > { %570 = vmatpush3.msra.mxu0 %v263_v4  ;;  %605 = vmatpush3.msra.mxu1 %v357_v10  ;;  %v252_v27 = vld [vmem:[#allocation2 + $0x8] sm:$0xff]  ;;  %v348_v28 = vld [vmem:[#allocation4 + $0x18] sm:$0xff]  ;;  %v251_v29 = vld [vmem:[#allocation2] sm:$0xff] }
  0x33   : > { %571 = vmatprep.subr.mxu0 %v738_v0  ;;  %606 = vmatprep.subr.mxu1 %v738_v0  ;;  %v250_v30 = vld [vmem:[%s245_s12] sm:$0xff]  ;;  %v347_v31 = vld [vmem:[#allocation4 + $0x10] sm:$0xff]  ;;  %v346_v32 = vld [vmem:[#allocation4 + $0x8] sm:$0xff] }
  0x34   : > { %572 = vmatpush3.msra.mxu0 %v262_v6  ;;  %607 = vmatpush3.msra.mxu1 %v356_v12  ;;  %v345_v33 = vld [vmem:[#allocation4] sm:$0xff] }
  0x35   : > { %573 = vmatprep.subr.mxu0 %v738_v0  ;;  %608 = vmatprep.subr.mxu1 %v738_v0  ;;  %v525_v34 = vld [vmem:[%s881_s2] ss:$0 sm:$0xff] }
  0x36   : > { %574 = vmatpush3.msra.mxu0 %v261_v9  ;;  %609 = vmatpush3.msra.mxu1 %v355_v14  ;;  %v526_v39 = vld [vmem:[%s883_s4] ss:$0 sm:$0xff] }
  0x37   : > { %575 = vmatprep.subr.mxu0 %v738_v0  ;;  %610 = vmatprep.subr.mxu1 %v738_v0 }
  0x38   : > { %576 = vmatpush3.msra.mxu0 %v260_v11  ;;  %611 = vmatpush3.msra.mxu1 %v354_v16 }
  0x39   : > { %577 = vmatprep.subr.mxu0 %v738_v0  ;;  %612 = vmatprep.subr.mxu1 %v738_v0 }
  0x3a   : > { %578 = vmatpush3.msra.mxu0 %v259_v13  ;;  %613 = vmatpush3.msra.mxu1 %v353_v18 }
  0x3b   : > { %579 = vmatprep.subr.mxu0 %v738_v0  ;;  %614 = vmatprep.subr.mxu1 %v738_v0 }
  0x3c   : > { %580 = vmatpush3.msra.mxu0 %v258_v15  ;;  %615 = vmatpush3.msra.mxu1 %v352_v20 }
  0x3d   : > { %581 = vmatprep.subr.mxu0 %v738_v0  ;;  %616 = vmatprep.subr.mxu1 %v738_v0 }
  0x3e   : > { %582 = vmatpush3.msra.mxu0 %v257_v17  ;;  %617 = vmatpush3.msra.mxu1 %v351_v22 }
  0x3f   : > { %583 = vmatprep.subr.mxu0 %v738_v0  ;;  %618 = vmatprep.subr.mxu1 %v738_v0 }
  0x40   : > { %584 = vmatpush3.msra.mxu0 %v256_v19  ;;  %619 = vmatpush3.msra.mxu1 %v350_v24 }
  0x41   : > { %585 = vmatprep.subr.mxu0 %v738_v0  ;;  %620 = vmatprep.subr.mxu1 %v738_v0 }
  0x42   : > { %586 = vmatpush3.msra.mxu0 %v255_v21  ;;  %621 = vmatpush3.msra.mxu1 %v349_v26 }
  0x43   : > { %587 = vmatprep.subr.mxu0 %v738_v0  ;;  %622 = vmatprep.subr.mxu1 %v738_v0 }
  0x44   : > { %588 = vmatpush3.msra.mxu0 %v254_v23  ;;  %623 = vmatpush3.msra.mxu1 %v348_v28 }
  0x45   : > { %589 = vmatprep.subr.mxu0 %v738_v0  ;;  %624 = vmatprep.subr.mxu1 %v738_v0 }
  0x46   : > { %590 = vmatpush3.msra.mxu0 %v253_v25  ;;  %625 = vmatpush3.msra.mxu1 %v347_v31 }
  0x47   : > { %591 = vmatprep.subr.mxu0 %v738_v0  ;;  %626 = vmatprep.subr.mxu1 %v738_v0 }
  0x48   : > { %592 = vmatpush3.msra.mxu0 %v252_v27  ;;  %627 = vmatpush3.msra.mxu1 %v346_v32 }
  0x49   : > { %593 = vmatprep.subr.mxu0 %v738_v0  ;;  %628 = vmatprep.subr.mxu1 %v738_v0 }
  0x4a   : > { %594 = vmatpush3.msra.mxu0 %v251_v29  ;;  %629 = vmatpush3.msra.mxu1 %v345_v33 }
  0x4b   : > { %596 = vmatmul.mubr.f32.vlgmr.msra.gmra.mxu0 %v250_v30 }
 0x10b   : > { %v340_v35 = vpop.f32.mrf.mxu0 }
 0x10c   : > { %v341_v36 = vadd.f32 %v525_v34, %v340_v35 }
 0x10d   : > { %v597_v37 = vpop.f32.mrf.mxu0 }
 0x10e   : > { %v344_v38 = vmax.f32 %v341_v36, 0.0 }
 0x110   : > { %631 = vmatmul.mubr.f32.vlgmr.msra.gmra.mxu1 %v344_v38 }
 0x1d0   : > { %v434_v40 = vpop.f32.mrf.mxu1 }
 0x1d1   : > { %v435_v41 = vadd.f32 %v526_v39, %v434_v40 }
 0x1d2   : > { %v632_v42 = vpop.f32.mrf.mxu1 }
 0x1d3   : > { %438 = vst [vmem:[%s249_s21] sm:$0xff] %v435_v41 }
 0x1d4 PF: > { %s17_s18 = sadd.s32 1, %s732_s18  }
 0x1d5   : > { %p14_p3 = scmp.ge.s32.totalorder %s17_s18, 4  }
 0x1d7   :  { %16 = sbr.rel (!%p14_p3) target bundleno = 2 (0x2), region = 79 }
 0x1dc   :  { %458 = vsyncpa [#allocation3], 1 }
 0x1dd   :  { %460 = vsyncpa [#allocation3 + $0x1], 1 }
 0x1de   :  { %461 = vsyncpa [#allocation5], 1 }

</bundles_post_ra>
